<compile_context>
chip_gen: v7x
topology: tpu7x:2x2x1
jax: 0.10.0
libtpu: 0.0.40
codegen_flags: <defaults>
</compile_context>

<pallas_src>
from functools import partial

import jax
import jax.numpy as jnp
from jax.experimental import pallas as pl
from jax.experimental.pallas import tpu as pltpu


# ----------------------------------------------------------------------------
# Shared in-kernel softmax body (fp32 compute, EUP reciprocal + Newton step).
# ----------------------------------------------------------------------------
def _softmax_rows(x_f32, scale, axis):
    if scale == 1.0:
        m = jnp.max(x_f32, axis=axis, keepdims=True)
        e = jnp.exp(x_f32 - m)
    elif scale > 0.0:
        # Positive pre-scale folded into the exp argument: saves one full-tile
        # VALU multiply and one live fp32 temporary (smaller vreg/VMEM set).
        m = jnp.max(x_f32, axis=axis, keepdims=True)
        e = jnp.exp((x_f32 - m) * jnp.float32(scale))
    else:
        # Non-positive scales flip the ordering; scale first for stability.
        xs = x_f32 * jnp.float32(scale)
        m = jnp.max(xs, axis=axis, keepdims=True)
        e = jnp.exp(xs - m)
    s = jnp.sum(e, axis=axis, keepdims=True)
    # EUP approximate reciprocal (frees the VALU divide) + one Newton step for
    # full f32 accuracy; s is only a thin slab so the refinement is negligible.
    r = pl.reciprocal(s, approx=True)
    r = r * (2.0 - s * r)
    return e * r


def _make_lastdim_kernel(scale):
    def kernel(x_ref, o_ref):
        x = x_ref[...].astype(jnp.float32)
        o_ref[...] = _softmax_rows(x, scale, -1).astype(o_ref.dtype)
    return kernel


def _make_sublane_kernel(scale):
    # Softmax over the sublane (second-to-last) axis; reductions go through
    # the XLU (a slot with slack here), last axis stays lane-dense.
    def kernel(x_ref, o_ref):
        x = x_ref[...].astype(jnp.float32)
        o_ref[...] = _softmax_rows(x, scale, -2).astype(o_ref.dtype)
    return kernel


# ----------------------------------------------------------------------------
# Helpers
# ----------------------------------------------------------------------------
def _round_up(v, m):
    return ((v + m - 1) // m) * m


def _vmem_capacity_bytes():
    try:
        return int(pltpu.get_tpu_info().vmem_capacity_bytes)
    except Exception:
        return 64 << 20  # conservative default (v7x per-TC VMEM)


# ----------------------------------------------------------------------------
# Last-dim softmax over a (R, N) view.  Returns None if the shape should fall
# back to XLA's fused softmax.
# ----------------------------------------------------------------------------
def _softmax_lastdim_2d(x2d, scale, itemsize, budget, vmem_limit):
    R, N = x2d.shape
    sublane_mult = max(8, 32 // itemsize)  # 8 f32, 16 bf16, 32 i8
    # Per-row VMEM bytes held per grid step: 2x(in+out) pipeline buffers in the
    # input dtype + ~3 live fp32 full-tile intermediates (x, e, e*r).
    bytes_per_row = N * (4 * itemsize + 3 * 4)

    # Lane-sparse axes (N < 128) would make every store a masked partial vst
    # (the biggest measured store-path lever); rows whose minimal tile blows
    # the VMEM budget cannot be pipelined -> XLA fused softmax instead.
    # TODO(synk): an online-softmax variant (grid over N marked 'arbitrary',
    # running max/sum scratch, pl.when finalize) would keep huge-N rows at
    # one HBM read + one write.
    if N < 128 or bytes_per_row * sublane_mult > budget:
        return None

    if R <= sublane_mult:
        tr = R  # full-dim block (== array dim, allowed by the (8,128) rule)
    else:
        r_ceil = _round_up(R, sublane_mult)
        tr = (budget // bytes_per_row) // sublane_mult * sublane_mult
        tr = max(sublane_mult, min(tr, r_ceil))
        # Pipeline-depth guarantee: aim for >= 8 grid steps whenever R permits
        # (>= 2 steps per v7x TensorCore plus prefetch/writeback overlap; a
        # 1-step grid on v5e/v6e gets zero double-buffering benefit).
        max_steps = r_ceil // sublane_mult
        want_steps = min(8, max_steps)
        if want_steps > 1:
            tr = min(tr, _round_up(pl.cdiv(r_ceil, want_steps), sublane_mult))
        # Balance tiles so the ragged final block is never nearly empty and the
        # parallel axis splits evenly across TensorCores.
        steps = pl.cdiv(R, tr)
        tr = max(sublane_mult, min(_round_up(pl.cdiv(R, steps), sublane_mult), tr))

    grid = (pl.cdiv(R, tr),)
    # No padding: Pallas edge blocks read only the valid rows and drop writes
    # past R; garbage in the final block stays confined to dropped rows.
    return pl.pallas_call(
        _make_lastdim_kernel(scale),
        out_shape=jax.ShapeDtypeStruct((R, N), x2d.dtype),
        grid=grid,
        in_specs=[pl.BlockSpec((tr, N), lambda i: (i, 0))],
        out_specs=pl.BlockSpec((tr, N), lambda i: (i, 0)),
        compiler_params=pltpu.CompilerParams(
            dimension_semantics=("parallel",),
            vmem_limit_bytes=vmem_limit,
        ),
    )(x2d)


# ----------------------------------------------------------------------------
# dim == ndim-2 softmax over a (B, S, L) view without any transpose: reduce
# over the sublane axis inside the kernel, keep the last axis lane-dense.
# Returns None if not feasible (caller falls back to the transpose path).
# ----------------------------------------------------------------------------
def _softmax_sublane_3d(x3d, scale, itemsize, budget, vmem_limit):
    B, S, L = x3d.shape
    bytes_per_lane = S * (4 * itemsize + 3 * 4)
    tl = (budget // bytes_per_lane) // 128 * 128
    if tl < 128:
        return None  # even a 128-lane tile blows VMEM -> transpose/XLA path
    tl = min(tl, _round_up(L, 128))
    # Keep some grid depth for DMA/compute overlap and v7x TC sharding.
    lane_steps_possible = max(1, L // 128)
    want_lane_steps = min(lane_steps_possible, max(1, pl.cdiv(8, B)))
    if want_lane_steps > 1:
        tl = min(tl, _round_up(pl.cdiv(L, want_lane_steps), 128))

    grid = (B, pl.cdiv(L, tl))
    return pl.pallas_call(
        _make_sublane_kernel(scale),
        out_shape=jax.ShapeDtypeStruct((B, S, L), x3d.dtype),
        grid=grid,
        in_specs=[pl.BlockSpec((1, S, tl), lambda b, j: (b, 0, j))],
        out_specs=pl.BlockSpec((1, S, tl), lambda b, j: (b, 0, j)),
        compiler_params=pltpu.CompilerParams(
            dimension_semantics=("parallel", "parallel"),
            vmem_limit_bytes=vmem_limit,
        ),
    )(x3d)


# ----------------------------------------------------------------------------
# Jitted dispatcher (dim and scale are static -> baked into the kernels).
# ----------------------------------------------------------------------------
@partial(jax.jit, static_argnums=(1, 2))
def _softmax_impl(x, dim, scale):
    ndim = x.ndim
    last = ndim - 1
    itemsize = jnp.dtype(x.dtype).itemsize

    vmem_cap = _vmem_capacity_bytes()
    vmem_limit = min(48 << 20, (vmem_cap * 3) // 4)
    # Generation-aware tile budget, accounting for 2x(in+out) pipeline buffers
    # plus ~3 fp32 intermediates: ~16 MiB on v7x (64 MiB/TC), ~24 MiB on
    # v5e/v6e (128 MiB), always well under vmem_limit.
    budget = min(vmem_cap // 4, 24 << 20)

    def xla_fallback(xx, axis):
        y = jax.nn.softmax(xx.astype(jnp.float32) * jnp.float32(scale), axis=axis)
        return y.astype(xx.dtype)

    if dim == last:
        N = x.shape[-1]
        lead = x.shape[:-1]
        x2d = x.reshape(-1, N)
        out2d = _softmax_lastdim_2d(x2d, scale, itemsize, budget, vmem_limit)
        if out2d is None:
            return xla_fallback(x, dim)
        return out2d.reshape(*lead, N)

    if dim == last - 1 and ndim >= 2 and x.shape[-1] >= 128:
        S = x.shape[dim]
        L = x.shape[-1]
        x3d = x.reshape(-1, S, L)
        out3d = _softmax_sublane_3d(x3d, scale, itemsize, budget, vmem_limit)
        if out3d is not None:
            return out3d.reshape(x.shape)

    # Generic: move the softmax axis to the lane dimension (transpose
    # round-trip).  Only rarely-hit dims pay this cost now.
    perm = [i for i in range(ndim) if i != dim] + [dim]
    inv_perm = [0] * ndim
    for pos, ax in enumerate(perm):
        inv_perm[ax] = pos
    xt = jnp.transpose(x, perm)
    N = xt.shape[-1]
    x2d = xt.reshape(-1, N)
    out2d = _softmax_lastdim_2d(x2d, scale, itemsize, budget, vmem_limit)
    if out2d is None:
        out2d = xla_fallback(x2d, -1)
    return jnp.transpose(out2d.reshape(xt.shape), inv_perm)


def softmax(x, dim=None, invAttnHead=None):
    """JAX/Pallas equivalent of the Habana Softmax module forward."""
    if dim is None:
        dim = -1
    dim = dim % x.ndim

    if invAttnHead is None:
        scale = 1.0
    else:
        try:
            scale = float(invAttnHead)
        except (TypeError, ValueError, jax.errors.ConcretizationTypeError):
            # Traced / non-static scale: stay correct via XLA's fused softmax.
            y = jax.nn.softmax(x.astype(jnp.float32) * invAttnHead, axis=dim)
            return y.astype(x.dtype)

    return _softmax_impl(x, dim, scale)


if __name__ == "__main__":
    key = jax.random.PRNGKey(0)
    k1, k2, k3, k4, k5, k6 = jax.random.split(key, 6)
    inv_attn_head = 1.0 / (64.0 ** 0.5)

    # 1) Attention-score-like input (Pallas lane-dense last-dim path).
    x = jax.random.normal(k1, (2, 4, 16, 128), dtype=jnp.float32)
    out = jax.block_until_ready(softmax(x, dim=-1, invAttnHead=inv_attn_head))
    ref = jax.nn.softmax(x * inv_attn_head, axis=-1)
    assert out.shape == x.shape and out.dtype == x.dtype
    assert jnp.allclose(out, ref, atol=2e-5, rtol=2e-5)
    assert jnp.allclose(jnp.sum(out, axis=-1), 1.0, atol=1e-4)

    # 2) Ragged row count (R = 2*4*19 = 152): exercises the pad-free
    #    edge-block path.
    x_r = jax.random.normal(k2, (2, 4, 19, 128), dtype=jnp.float32)
    out_r = jax.block_until_ready(softmax(x_r, dim=-1, invAttnHead=inv_attn_head))
    ref_r = jax.nn.softmax(x_r * inv_attn_head, axis=-1)
    assert jnp.allclose(out_r, ref_r, atol=2e-5, rtol=2e-5)

    # 3) dim == ndim-2 with a lane-dense last axis: sublane-reduction kernel
    #    (no transpose round-trip).
    x_s = jax.random.normal(k3, (2, 64, 256), dtype=jnp.float32)
    out_s = jax.block_until_ready(softmax(x_s, dim=1, invAttnHead=inv_attn_head))
    ref_s = jax.nn.softmax(x_s * inv_attn_head, axis=1)
    assert jnp.allclose(out_s, ref_s, atol=2e-5, rtol=2e-5)

    # 4) Small-N case (kv_len=32 < 128): documented lane-sparse XLA fallback.
    x_sm = jax.random.normal(k4, (2, 4, 8, 32), dtype=jnp.float32)
    out_sm = jax.block_until_ready(softmax(x_sm, dim=-1, invAttnHead=inv_attn_head))
    ref_sm = jax.nn.softmax(x_sm * inv_attn_head, axis=-1)
    assert jnp.allclose(out_sm, ref_sm, atol=2e-5, rtol=2e-5)

    # 5) Non-last-dim softmax with a lane-sparse last axis (transpose path),
    #    invAttnHead=None.
    x3 = jax.random.normal(k5, (2, 3, 128, 20), dtype=jnp.float32)
    out3 = jax.block_until_ready(softmax(x3, dim=2, invAttnHead=None))
    ref3 = jax.nn.softmax(x3, axis=2)
    assert out3.shape == x3.shape and out3.dtype == x3.dtype
    assert jnp.allclose(out3, ref3, atol=2e-5, rtol=2e-5)

    # 6) bf16 input (16-row sublane tiles, fp32 compute inside the kernel).
    x_bf = jax.random.normal(k6, (2, 4, 16, 128), dtype=jnp.bfloat16)
    out_bf = jax.block_until_ready(softmax(x_bf, dim=-1, invAttnHead=inv_attn_head))
    ref_bf = jax.nn.softmax(x_bf.astype(jnp.float32) * inv_attn_head, axis=-1)
    assert out_bf.dtype == jnp.bfloat16
    assert jnp.allclose(out_bf.astype(jnp.float32), ref_bf, atol=1e-2, rtol=1e-2)

    print("KERNEL_OK")
</pallas_src>

<mosaic_0001>
module attributes {stable_mosaic.version = 11 : i64} {
  func.func @kernel(%arg0: i32, %arg1: memref<16x128xf32, #tpu.memory_space<vmem>>, %arg2: memref<16x128xf32, #tpu.memory_space<vmem>>) attributes {dimension_semantics = [#tpu.dimension_semantics<parallel>], iteration_bounds = array<i64: 8>, scalar_prefetch = 0 : i64, scratch_operands = 0 : i64, tpu.core_type = #tpu.core_type<tc>, window_params = [{transform_indices = @transform_0, window_bounds = array<i64: 16, 128>}, {transform_indices = @transform_1, window_bounds = array<i64: 16, 128>}]} {
    %c0 = arith.constant 0 : index
    %c0_0 = arith.constant 0 : index
    %0 = vector.load %arg1[%c0, %c0_0] : memref<16x128xf32, #tpu.memory_space<vmem>>, vector<16x128xf32>
    %cst = arith.constant dense<0xFF800000> : vector<16xf32>
    %1 = vector.multi_reduction <maximumf>, %0, %cst [1] : vector<16x128xf32> to vector<16xf32>
    %2 = vector.shape_cast %1 : vector<16xf32> to vector<16x1xf32>
    %3 = vector.broadcast %2 : vector<16x1xf32> to vector<16x128xf32>
    %4 = arith.subf %0, %3 : vector<16x128xf32>
    %cst_1 = arith.constant 1.250000e-01 : f32
    %5 = vector.broadcast %cst_1 : f32 to vector<16x128xf32>
    %6 = arith.mulf %4, %5 : vector<16x128xf32>
    %7 = math.exp %6 : vector<16x128xf32>
    %cst_2 = arith.constant dense<0.000000e+00> : vector<16xf32>
    %8 = vector.multi_reduction <add>, %7, %cst_2 [1] : vector<16x128xf32> to vector<16xf32>
    %9 = vector.shape_cast %8 : vector<16xf32> to vector<16x1xf32>
    %10 = tpu.reciprocal %9 {approx = true} : vector<16x1xf32> -> vector<16x1xf32>
    %11 = arith.mulf %9, %10 : vector<16x1xf32>
    %cst_3 = arith.constant 2.000000e+00 : f32
    %12 = vector.broadcast %cst_3 : f32 to vector<16x1xf32>
    %13 = arith.subf %12, %11 : vector<16x1xf32>
    %14 = arith.mulf %10, %13 : vector<16x1xf32>
    %15 = vector.broadcast %14 : vector<16x1xf32> to vector<16x128xf32>
    %16 = arith.mulf %7, %15 : vector<16x128xf32>
    %c0_4 = arith.constant 0 : index
    %c0_5 = arith.constant 0 : index
    %17 = vector.load %arg2[%c0_4, %c0_5] : memref<16x128xf32, #tpu.memory_space<vmem>>, vector<16x128xf32>
    tpu.vector_store %arg2[%c0_4, %c0_5], %16 {strides = array<i32>} : memref<16x128xf32, #tpu.memory_space<vmem>>, vector<16x128xf32>,
    return
  }
  func.func @transform_0(%arg0: i32) -> (i32, i32) {
    %c0_i32 = arith.constant 0 : i32
    %c0_i32_0 = arith.constant 0 : i32
    return %arg0, %c0_i32 : i32, i32
  }
  func.func @transform_1(%arg0: i32) -> (i32, i32) {
    %c0_i32 = arith.constant 0 : i32
    %c0_i32_0 = arith.constant 0 : i32
    return %arg0, %c0_i32 : i32, i32
  }
}

</mosaic_0001>

<bundles_post_ra>
// kernel: _softmax_impl.1
= control target key start
LH: loop header
LB: loop body
LE: loop exit
PB: predicated region body
PF: predicated region fallthrough
CT: control target
= control target key end

     0   :  { %6 = vsyncpa [#allocation3], 0  ;;  %s606_s0 = inlined_call_operand.hbm [shape: f32[128,128], index: 0, kind: input, shape index: {}]   ;;  %s607_s1 = inlined_call_operand.hbm [shape: f32[128,128], index: 1, kind: output, shape index: {}]  }
   0x1   :  { %8 = vsyncpa [#allocation3 + $0x1], 0 }
   0x2   :  { %9 = vsyncpa [#allocation4], 0 }
   0x3   :  { %11 = vsyncpa [#allocation4 + $0x1], 0  ;;  %s442_s6 = smov 0   ;;  %s444_s7 = smov 0  }
   0x4   :  { %s446_s8 = smov 0   ;;  %s448_s9 = smov 0  }
   0x5 LB: > { %s463_s10 = sadd.s32 4294967295, %s424_s9   ;;  %s254_s11 = sadd.s32 4294967294, %s424_s9   ;;  %s424_s9 = sphi %s448_s9, %s619_s9   ;;  %s420_s8 = sphi %s446_s8, %s618_s8   ;;  %s416_s7 = sphi %s444_s7, %s617_s7   ;;  %s412_s6 = sphi %s442_s6, %s616_s6  }
   0x6   : > { %s467_s12 = sadd.s32 1, %s424_s9   ;;  %s24_s13 = sadd.s32 1, %s420_s8 }
   0x7   : > { %s21_s14 = ssub.s32 %s424_s9, %s467_s12  ;;  %p31_p0 = scmp.ne.s32.totalorder %s420_s8, %s416_s7 }
   0x8   : > { %p22_p1 = scmp.eq.s32.totalorder %s21_s14, 0  ;;  %p32_p2 = scmp.eq.s32.totalorder %s424_s9, 0 }
   0x9   : > { %p37_p3 = scmp.ne.s32.totalorder %s416_s7, %s412_s6  ;;  %p38_p4 = scmp.eq.s32.totalorder %s463_s10, 0 }
   0xa   : > { %s479_s15 = scalar_select %p22_p1, %s420_s8, %s24_s13  }
   0xb   : > { %p481_p5 = por %p32_p2, %p31_p0  ;;  %p485_p6 = por %p38_p4, %p37_p3 }
   0xc   : > { %p61_p7 = scmp.eq.s32.totalorder %s463_s10, 7  ;;  %p67_p8 = scmp.eq.s32.totalorder %s254_s11, 7 }
   0xd   : > { %p282_p9 = scmp.lt.s32.totalorder %s424_s9, 8  ;;  %s87_s20 = sand.u32 1, %s420_s8  }
   0xe   : > { %p491_p10 = por %p61_p7, %p31_p0  ;;  %p495_p11 = por %p67_p8, %p37_p3 }
   0xf   : > { %s268_s21 = sshll.u32 %s424_s9, 8  ;;  %s257_s22 = sshll.u32 %s87_s20, 4 }
  0x10   : > { %s611_s18 = scalar_select %p491_p10, 1, 0 }
  0x11   : > { %s612_s19 = scalar_select %p495_p11, 1, 0 }
  0x12   : > { %s504_s25 = scalar_lea.hbm %s606_s0, %s268_s21  ;;  %s91_s26 = scalar_lea.vmem [#allocation2], %s257_s22 }
  0x13   : > { %s98_s27 = sshll.u32 %s91_s26, 4  ;;  %p508_p12 = pnand %p282_p9, %p481_p5  ;;  %s512_s27 = int_to_ptr.vmem [resolvable:$true] %s98_s27 }
  0x14   : > { %s514_s29 = scalar_lea.sflag [#allocation3], %s87_s20  ;;  %s328_s30 = scalar_lea.hbm %s504_s25, 256 }
  0x15   : > { %p329_p13 = scmp.ne.s32.totalorder %s504_s25, %s328_s30  ;;  %p330_p0 = pneg %p508_p12 }
  0x16   : > { %s333_s4 = scalar_lea.hbm %s606_s0, 2048  ;;  %p334_p3 = scmp.lt.u32.totalorder %s504_s25, %s606_s0 }
  0x17   : > { %p331_p1 = pnand %p330_p0, %p329_p13  ;;  %p335_p4 = scmp.lt.u32.totalorder %s333_s4, %s328_s30 }
  0x18   : > { %p337_p7 = scmp.lt.u32.totalorder %s328_s30, %s504_s25 }
  0x19   : > { %p332_p2 = pneg %p331_p1  ;;  %p336_p5 = por %p335_p4, %p334_p3 }
  0x1b   : > { %p338_p8 = por %p337_p7, %p336_p5 }
  0x1d   : > { %p339_p9 = pnand %p338_p8, %p332_p2 }
  0x1f   : > { %342 = shalt.err (!%p339_p9)
}
  0x20   : > { %s343_s13 = scalar_lea.vmem %s512_s27, 256  ;;  %s426_s14 = smov [#allocation2]  }
  0x21   : > { %p344_p13 = scmp.ne.s32.totalorder %s512_s27, %s343_s13  ;;  %s348_s16 = sshll.u32 %s426_s14, 4  ;;  %s349_s16 = int_to_ptr.vmem [resolvable:$false] %s348_s16 }
  0x22   : > { %s350_s20 = scalar_lea.vmem %s349_s16, 512  ;;  %p351_p10 = scmp.lt.s32.totalorder %s512_s27, %s349_s16 }
  0x23   : > { %p346_p1 = pnand %p344_p13, %p330_p0  ;;  %p352_p3 = scmp.lt.s32.totalorder %s350_s20, %s343_s13 }
  0x25   : > { %p347_p11 = pneg %p346_p1  ;;  %p353_p4 = por %p352_p3, %p351_p10 }
  0x27   : > { %p354_p5 = pnand %p353_p4, %p347_p11 }
  0x29   : > { %357 = shalt.err (!%p354_p5)
}
  0x2a   : > { %s427_s21 = smov 128   ;;  %s428_s22 = smov 8  }
  0x2b   : > { %277 = dma.hbm_to_vmem [thread:$0]  (!%p508_p12), %s504_s25, 256, %s512_s27, %s514_s29, %s427_s21, %s427_s21, %s428_s22  }
  0x2c   : > { %p260_p0 = scmp.ge.s32.totalorder %s424_s9, 1  ;;  %p106_p2 = scmp.lt.s32.totalorder %s424_s9, 9 }
  0x2e   : > { %p107_p7 = pnand %p260_p0, %p106_p2 }
  0x2f   : > { %s545_s23 = sand.u32 (!%p107_p7), 1, %s416_s7  }
  0x30   : > { %110 = sbr.rel (%p107_p7) target bundleno = 396 (0x18c), region = 24  ;;  %s261_s24 = sshll.u32 (!%p107_p7), %s545_s23, 4 }
  0x31   : > { %s113_s26 = scalar_lea.sflag (!%p107_p7), [#allocation3], %s545_s23  ;;  %s116_s30 = scalar_lea.vmem (!%p107_p7), [#allocation2], %s261_s24 }
  0x37   : > { %403 = dma.done.wait (%p485_p6), %s113_s26, 256  }
  0x38   : > { %405 = vsyncadd (%p485_p6), %s113_s26, 4294967040  ;;  %v137_v0 = vld [vmem:[%s116_s30] sm:$0xff]  ;;  %v138_v1 = vld [vmem:[%s116_s30 + $0x8] sm:$0xff]  ;;  %s134_s17 = scalar_lea.vmem [#allocation5], %s261_s24  ;;  %s269_s27 = sshll.u32 %s463_s10, 8 }
  0x39   : > { %139 = vmax.xlane.f32.xlu0 %v137_v0  ;;  %s181_s25 = sshll.u32 %s134_s17, 4  ;;  %s561_s2 = scalar_lea.hbm %s607_s1, %s269_s27  ;;  %s563_s25 = int_to_ptr.vmem [resolvable:$true] %s181_s25 }
  0x3a   : > { %s168_s3 = scalar_lea.sflag [#allocation4], %s545_s23  ;;  %s358_s4 = scalar_lea.vmem %s563_s25, 256 }
  0x3b   : > { %p359_p6 = scmp.ne.s32.totalorder %s563_s25, %s358_s4  ;;  %p614_p10 = scmp.ne.s32.totalorder %s611_s18, 0 }
  0x3c   : > { %s429_s10 = smov [#allocation5]  }
  0x3d   : > { %141 = vmax.xlane.f32.xlu0 %v138_v1  ;;  %p360_p11 = pnand %p359_p6, %p614_p10  ;;  %s362_s5 = sshll.u32 %s429_s10, 4  ;;  %s363_s5 = int_to_ptr.vmem [resolvable:$false] %s362_s5 }
  0x3e   : > { %s364_s11 = scalar_lea.vmem %s363_s5, 512  ;;  %p365_p8 = scmp.lt.s32.totalorder %s563_s25, %s363_s5 }
  0x3f   : > { %p361_p12 = pneg %p360_p11  ;;  %p366_p9 = scmp.lt.s32.totalorder %s364_s11, %s358_s4 }
  0x41   : > { %p367_p13 = por %p366_p9, %p365_p8 }
  0x43   : > { %p368_p1 = pnand %p367_p13, %p361_p12 }
  0xc6   : > { %v140_v2 = vpop.xlane.xlu0 %139 }
  0xc7   : > { %v143_v3 = vsub.f32 %v137_v0, %v140_v2 }
  0xc9   : > { %v145_v4 = vmul.f32 0.125, %v143_v3 }
  0xca   : > { %v142_v5 = vpop.xlane.xlu0 %141 }
  0xcb   : > { %v147_v6 = vmul.f32 1.442695, %v145_v4  ;;  %v144_v7 = vsub.f32 %v138_v1, %v142_v5 }
  0xcd   : > { %320 = vpow2.f32 %v147_v6  ;;  %v146_v8 = vmul.f32 0.125, %v144_v7 }
  0xcf   : > { %v149_v9 = vmul.f32 1.442695, %v146_v8 }
  0xd1   : > { %322 = vpow2.f32 %v149_v9 }
  0xd7   : > { %v321_v10 = vpop.eup %320 }
  0xd8   : > { %151 = vadd.xlane.f32.xlu1 %v321_v10 }
  0xdb   : > { %v323_v11 = vpop.eup %322 }
  0xdc   : > { %153 = vadd.xlane.f32.xlu1 %v323_v11 }
 0x165   : > { %v152_v12 = vpop.xlane.xlu1 %151 }
 0x166   : > { %324 = vrcp.f32 %v152_v12 }
 0x169   : > { %v154_v13 = vpop.xlane.xlu1 %153 }
 0x16a   : > { %326 = vrcp.f32 %v154_v13 }
 0x170   : > { %v325_v14 = vpop.eup %324 }
 0x171   : > { %v157_v15 = vmul.f32 %v325_v14, %v152_v12 }
 0x173   : > { %v159_v16 = vsub.f32 2.0, %v157_v15 }
 0x174   : > { %v327_v17 = vpop.eup %326 }
 0x175   : > { %v161_v18 = vmul.f32 %v325_v14, %v159_v16  ;;  %v158_v19 = vmul.f32 %v327_v17, %v154_v13 }
 0x177   : > { %v163_v20 = vmul.f32 %v321_v10, %v161_v18  ;;  %v160_v21 = vsub.f32 2.0, %v158_v19 }
 0x179   : > { %165 = vst [vmem:[%s134_s17] sm:$0xff] %v163_v20  ;;  %v162_v22 = vmul.f32 %v327_v17, %v160_v21 }
 0x17b   : > { %v164_v23 = vmul.f32 %v323_v11, %v162_v22 }
 0x17d   : > { %166 = vst [vmem:[%s134_s17 + $0x8] sm:$0xff] %v164_v23 }
 0x17e   : > { %371 = shalt.err (!%p368_p1)
}
 0x17f   : > { %s372_s13 = scalar_lea.hbm %s561_s2, 256  ;;  %s376_s20 = scalar_lea.hbm %s607_s1, 2048 }
 0x180   : > { %p373_p3 = scmp.ne.s32.totalorder %s561_s2, %s372_s13  ;;  %p377_p0 = scmp.lt.u32.totalorder %s561_s2, %s607_s1 }
 0x181   : > { %p378_p2 = scmp.lt.u32.totalorder %s376_s20, %s372_s13  ;;  %p380_p6 = scmp.lt.u32.totalorder %s372_s13, %s561_s2 }
 0x182   : > { %p374_p4 = pnand %p373_p3, %p614_p10 }
 0x183   : > { %p379_p7 = por %p378_p2, %p377_p0 }
 0x184   : > { %p375_p5 = pneg %p374_p4 }
 0x185   : > { %p381_p11 = por %p380_p6, %p379_p7 }
 0x187   : > { %p382_p12 = pnand %p381_p11, %p375_p5 }
 0x189   : > { %385 = shalt.err (!%p382_p12)
}
 0x18a   : > { %s430_s24 = smov 128   ;;  %s431_s26 = smov 8  }
 0x18b   : > { %272 = dma.vmem_to_hbm [thread:$0]  (%p614_p10), %s563_s25, 256, %s561_s2, %s168_s3, %s430_s24, %s430_s24, %s431_s26  }
 0x18c PF: > { %p283_p8 = scmp.ge.s32.totalorder %s424_s9, 2  ;;  %s196_s30 = sand.u32 1, %s412_s6  }
 0x18d   : > { %p615_p9 = scmp.ne.s32.totalorder %s612_s19, 0  ;;  %s197_s17 = scalar_lea.sflag [#allocation4], %s196_s30 }
 0x18f   : > { %p279_p13 = pnand %p283_p8, %p615_p9 }
 0x191   : > { %407 = dma.done.wait (!%p279_p13), %s197_s17, 256  }
 0x192   : > { %409 = vsyncadd (!%p279_p13), %s197_s17, 4294967040  ;;  %p14_p1 = scmp.ge.s32.totalorder %s467_s12, 10   ;;  %s616_s6 = smov %s416_s7 }
 0x193   : > { %s617_s7 = smov %s420_s8  ;;  %s618_s8 = smov %s479_s15 }
 0x194   : > { %s619_s9 = smov %s467_s12  ;;  %16 = sbr.rel (!%p14_p1) target bundleno = 5 (0x5), region = 69 }
 0x19b   :  { %202 = vsyncpa [#allocation3], 1 }
 0x19c   :  { %204 = vsyncpa [#allocation3 + $0x1], 1 }
 0x19d   :  { %205 = vsyncpa [#allocation4], 1 }
 0x19e   :  { %207 = vsyncpa [#allocation4 + $0x1], 1 }

</bundles_post_ra>
